<compile_context>
chip_gen: v6e
topology: v6e:2x2x1
jax: 0.10.0
libtpu: 0.0.40
codegen_flags: <defaults>
</compile_context>

<pallas_src>
import functools

import jax
import jax.numpy as jnp
from jax.experimental import pallas as pl
from jax.experimental.pallas import tpu as pltpu


def _round_up(x, m):
    return ((x + m - 1) // m) * m


def _num_tensorcores():
    """Best-effort TensorCores-per-chip query (v7x has 2). Safe fallback: 1."""
    try:
        info = pltpu.get_tpu_info()
        for attr in ("num_cores", "num_tensorcores", "cores_per_chip",
                     "num_cores_per_chip"):
            v = getattr(info, attr, None)
            if isinstance(v, int) and v > 0:
                return v
    except Exception:
        pass
    return 1


def _vmem_capacity_bytes():
    """Physical VMEM per core; fallback to the smallest generation (v7x 64 MiB)."""
    try:
        v = int(pltpu.get_tpu_info().vmem_capacity_bytes)
        if v > 0:
            return v
    except Exception:
        pass
    return 64 * 1024 * 1024


def _spatial_gather_kernel(probs_ref, feats_ref, out_ref,
                           m_ref, l_ref, acc_ref, *, scale):
    # probs_ref: (1, K, T_hw)   feats_ref: (1, C_t, T_hw)   out_ref: (1, K, C_t)
    # scratch:   m_ref / l_ref: (K, 1) f32,  acc_ref: (K, C_t) f32 (lane-dense in C)
    si = pl.program_id(2)

    @pl.when(si == 0)
    def _init():
        m_ref[...] = jnp.full_like(m_ref, -jnp.inf)
        l_ref[...] = jnp.zeros_like(l_ref)
        acc_ref[...] = jnp.zeros_like(acc_ref)

    # --- online softmax statistics (f32 for numerics) ------------------------
    p = probs_ref[0].astype(jnp.float32)                   # (K, T_hw)
    if scale != 1.0:
        p = p * scale
    m_prev = m_ref[...]                                     # (K, 1)
    m_new = jnp.maximum(m_prev, jnp.max(p, axis=-1, keepdims=True))
    e = jnp.exp(p - m_new)                                  # (K, T_hw), unnormalized
    alpha = jnp.exp(m_prev - m_new)                         # (K, 1) rescale of old state
    l_ref[...] = alpha * l_ref[...] + jnp.sum(e, axis=-1, keepdims=True)
    m_ref[...] = m_new

    # --- accumulate context: contract the spatial axis (last dim of both) ----
    # (K, T_hw) x (C_t, T_hw)^T -> (K, C_t); feats stay in native (C, HW) layout.
    partial = jax.lax.dot_general(
        e.astype(feats_ref.dtype), feats_ref[0],
        dimension_numbers=(((1,), (1,)), ((), ())),
        preferred_element_type=jnp.float32)                 # (K, C_t) f32
    acc_ref[...] = acc_ref[...] * alpha + partial           # no transpose needed

    # --- finalize: deferred softmax normalization (tiny K*C_t work) ----------
    @pl.when(si == pl.num_programs(2) - 1)
    def _finalize():
        inv_l = pl.reciprocal(l_ref[...], approx=False)     # (K, 1), exact
        out_ref[0] = (acc_ref[...] * inv_l).astype(out_ref.dtype)


def spatial_gather(feats, probs, scale=1.0, *,
                   hw_tile_target=8192, c_tile_target=512,
                   feats_block_bytes=8 * 1024 * 1024,
                   num_cores=None):
    """feats: (N, C, H, W), probs: (N, K, H, W) -> (N, C, K, 1)."""
    N, C, H, W = feats.shape
    _, K, _, _ = probs.shape
    HW = H * W

    feats_item = jnp.dtype(feats.dtype).itemsize
    probs_item = jnp.dtype(probs.dtype).itemsize

    # --- channel tile: cover C in ONE tile by default (no redundant probs DMA /
    # softmax recompute).  If we must split, t_c is a multiple of 128 so the
    # lane-dense (1, K, t_c) output block stays legal.
    t_c = C
    if C > c_tile_target:
        cand = (c_tile_target // 128) * 128
        while cand >= 128 and C % cand != 0:
            cand -= 128
        if cand >= 128:
            t_c = cand

    # v7x (2 TCs/chip): make sure there are >= num_cores parallel (b, ci) blocks,
    # even for single-image inference, at the cost of one extra K*HW probs read.
    if num_cores is None:
        num_cores = _num_tensorcores()
    if num_cores > 1 and N * (C // t_c) < num_cores:
        needed = -(-num_cores // max(N, 1))                 # ceil
        cand = (C // max(needed, 1)) // 128 * 128
        while cand >= 128:
            if C % cand == 0 and N * (C // cand) >= num_cores:
                t_c = cand
                break
            cand -= 128

    # --- spatial (reduction) tile: large per-step bytes, capped for VMEM ------
    cap_hw = max(128, (feats_block_bytes // max(t_c * feats_item, 1)) // 128 * 128)
    tgt_hw = max(128, (hw_tile_target // 128) * 128)
    t_hw = min(_round_up(HW, 128), tgt_hw, cap_hw)
    HW_pad = _round_up(HW, t_hw)

    probs_r = probs.reshape(N, K, HW)        # (N, K, HW)
    feats_r = feats.reshape(N, C, HW)        # (N, C, HW) -- no HBM transpose
    if HW_pad != HW:
        pad = HW_pad - HW
        # exp(-inf) = 0 -> padded positions get zero softmax weight (exact).
        probs_r = jnp.pad(probs_r, ((0, 0), (0, 0), (0, pad)),
                          constant_values=-jnp.inf)
        feats_r = jnp.pad(feats_r, ((0, 0), (0, 0), (0, pad)))

    grid = (N, C // t_c, HW_pad // t_hw)

    # --- explicit VMEM budget (v5e's 16 MiB scoped default is far too small) --
    k_pad = max(K, 8)
    need = (2 * t_c * t_hw * feats_item          # feats double buffer
            + 2 * k_pad * t_hw * probs_item      # probs double buffer
            + 2 * k_pad * t_c * feats_item       # out double buffer
            + k_pad * t_c * 4                    # f32 acc scratch
            + 2 * k_pad * 128 * 4)               # m / l scratch (lane padded)
    cap = _vmem_capacity_bytes()
    vmem_limit = int(min(cap - (8 << 20), max(32 << 20, 2 * need)))
    vmem_limit = max(vmem_limit, need + (2 << 20))

    kernel = functools.partial(_spatial_gather_kernel, scale=float(scale))

    ocr = pl.pallas_call(
        kernel,
        out_shape=jax.ShapeDtypeStruct((N, K, C), feats.dtype),
        grid_spec=pltpu.PrefetchScalarGridSpec(
            num_scalar_prefetch=0,
            grid=grid,
            in_specs=[
                pl.BlockSpec((1, K, t_hw), lambda b, ci, si: (b, 0, si)),
                pl.BlockSpec((1, t_c, t_hw), lambda b, ci, si: (b, ci, si)),
            ],
            out_specs=pl.BlockSpec((1, K, t_c), lambda b, ci, si: (b, 0, ci)),
            scratch_shapes=[
                pltpu.VMEM((K, 1), jnp.float32),    # running max  m
                pltpu.VMEM((K, 1), jnp.float32),    # running denom l
                pltpu.VMEM((K, t_c), jnp.float32),  # f32 context accumulator
            ],
        ),
        compiler_params=pltpu.CompilerParams(
            dimension_semantics=("parallel", "parallel", "arbitrary"),
            vmem_limit_bytes=vmem_limit),
    )(probs_r, feats_r)

    # (N, K, C) -> (N, C, K, 1): tiny XLA transpose (K*C elems per image).
    return jnp.transpose(ocr, (0, 2, 1))[..., None]


def spatial_gather_reference(feats, probs, scale=1.0):
    """Pure-JAX reference mirroring the PyTorch forward (use_gt=False)."""
    N, C, H, W = feats.shape
    K = probs.shape[1]
    p = probs.reshape(N, K, H * W)
    f = feats.reshape(N, C, H * W).transpose(0, 2, 1)
    p = jax.nn.softmax(scale * p, axis=2)
    ctx = jnp.einsum("nks,nsc->nkc", p, f)
    return ctx.transpose(0, 2, 1)[..., None]


if __name__ == "__main__":
    key = jax.random.PRNGKey(0)
    k1, k2, k3, k4 = jax.random.split(key, 4)

    # (1) Multi-tile HW path (online softmax over two 128-wide spatial tiles).
    N, C, K, H, W = 2, 32, 8, 16, 16          # HW = 256
    feats = jax.random.normal(k1, (N, C, H, W), dtype=jnp.float32)
    probs = jax.random.normal(k2, (N, K, H, W), dtype=jnp.float32)
    out = jax.block_until_ready(
        spatial_gather(feats, probs, scale=1.0, hw_tile_target=128))
    ref = spatial_gather_reference(feats, probs, scale=1.0)
    assert out.shape == (N, C, K, 1), out.shape
    assert jnp.allclose(out, ref, atol=2e-5, rtol=1e-5), float(
        jnp.max(jnp.abs(out - ref)))

    # (2) Non-128-divisible spatial size (exercises -inf/zero padding) + scale.
    H2 = W2 = 15                               # HW = 225 -> padded to 256
    feats2 = jax.random.normal(k3, (N, C, H2, W2), dtype=jnp.float32)
    probs2 = jax.random.normal(k4, (N, K, H2, W2), dtype=jnp.float32)
    out2 = jax.block_until_ready(
        spatial_gather(feats2, probs2, scale=2.0, hw_tile_target=128))
    ref2 = spatial_gather_reference(feats2, probs2, scale=2.0)
    assert out2.shape == (N, C, K, 1), out2.shape
    assert jnp.allclose(out2, ref2, atol=2e-5, rtol=1e-5), float(
        jnp.max(jnp.abs(out2 - ref2)))

    # (3) Default (single-tile) path with bf16 feats/probs (half the HBM bytes).
    feats_b = feats.astype(jnp.bfloat16)
    probs_b = probs.astype(jnp.bfloat16)
    out3 = jax.block_until_ready(spatial_gather(feats_b, probs_b, scale=1.0))
    ref3 = spatial_gather_reference(feats_b.astype(jnp.float32),
                                    probs_b.astype(jnp.float32), scale=1.0)
    assert jnp.allclose(out3.astype(jnp.float32), ref3, atol=3e-2, rtol=3e-2), float(
        jnp.max(jnp.abs(out3.astype(jnp.float32) - ref3)))

    print("KERNEL_OK")
</pallas_src>

<mosaic_0001>
module attributes {stable_mosaic.version = 11 : i64} {
  func.func @_spatial_gather_kernel(%arg0: i32, %arg1: i32, %arg2: i32, %arg3: memref<1x8x128xf32, #tpu.memory_space<vmem>>, %arg4: memref<1x32x128xf32, #tpu.memory_space<vmem>>, %arg5: memref<1x8x32xf32, #tpu.memory_space<vmem>>, %arg6: memref<8x1xf32, #tpu.memory_space<vmem>>, %arg7: memref<8x1xf32, #tpu.memory_space<vmem>>, %arg8: memref<8x32xf32, #tpu.memory_space<vmem>>) attributes {dimension_semantics = [#tpu.dimension_semantics<parallel>, #tpu.dimension_semantics<parallel>, #tpu.dimension_semantics<arbitrary>], iteration_bounds = array<i64: 2, 1, 2>, scalar_prefetch = 0 : i64, scratch_operands = 3 : i64, tpu.core_type = #tpu.core_type<tc>, window_params = [{transform_indices = @transform_0, window_bounds = array<i64: 1, 8, 128>}, {transform_indices = @transform_1, window_bounds = array<i64: 1, 32, 128>}, {transform_indices = @transform_2, window_bounds = array<i64: 1, 8, 32>}]} {
    %c0_i32 = arith.constant 0 : i32
    %0 = arith.cmpi eq, %arg2, %c0_i32 : i32
    %1 = arith.extui %0 : i1 to i32
    %c0_i32_0 = arith.constant 0 : i32
    %2 = arith.cmpi ne, %1, %c0_i32_0 : i32
    scf.if %2 {
      %cst_21 = arith.constant 0xFF800000 : f32
      %32 = vector.broadcast %cst_21 : f32 to vector<8x1xf32>
      %c0_22 = arith.constant 0 : index
      %c0_23 = arith.constant 0 : index
      %33 = vector.load %arg6[%c0_22, %c0_23] : memref<8x1xf32, #tpu.memory_space<vmem>>, vector<8x1xf32>
      tpu.vector_store %arg6[%c0_22, %c0_23], %32 {strides = array<i32>} : memref<8x1xf32, #tpu.memory_space<vmem>>, vector<8x1xf32>,
      %cst_24 = arith.constant 0.000000e+00 : f32
      %34 = vector.broadcast %cst_24 : f32 to vector<8x1xf32>
      %c0_25 = arith.constant 0 : index
      %c0_26 = arith.constant 0 : index
      %35 = vector.load %arg7[%c0_25, %c0_26] : memref<8x1xf32, #tpu.memory_space<vmem>>, vector<8x1xf32>
      tpu.vector_store %arg7[%c0_25, %c0_26], %34 {strides = array<i32>} : memref<8x1xf32, #tpu.memory_space<vmem>>, vector<8x1xf32>,
      %cst_27 = arith.constant 0.000000e+00 : f32
      %36 = vector.broadcast %cst_27 : f32 to vector<8x32xf32>
      %c0_28 = arith.constant 0 : index
      %c0_29 = arith.constant 0 : index
      %37 = vector.load %arg8[%c0_28, %c0_29] : memref<8x32xf32, #tpu.memory_space<vmem>>, vector<8x32xf32>
      tpu.vector_store %arg8[%c0_28, %c0_29], %36 {strides = array<i32>} : memref<8x32xf32, #tpu.memory_space<vmem>>, vector<8x32xf32>,
    } else {
    }
    %c0 = arith.constant 0 : index
    %c0_1 = arith.constant 0 : index
    %c0_2 = arith.constant 0 : index
    %3 = vector.load %arg3[%c0, %c0_1, %c0_2] : memref<1x8x128xf32, #tpu.memory_space<vmem>>, vector<1x8x128xf32>
    %4 = vector.shape_cast %3 : vector<1x8x128xf32> to vector<8x128xf32>
    %c0_3 = arith.constant 0 : index
    %c0_4 = arith.constant 0 : index
    %5 = vector.load %arg6[%c0_3, %c0_4] : memref<8x1xf32, #tpu.memory_space<vmem>>, vector<8x1xf32>
    %cst = arith.constant dense<0xFF800000> : vector<8xf32>
    %6 = vector.multi_reduction <maximumf>, %4, %cst [1] : vector<8x128xf32> to vector<8xf32>
    %7 = vector.shape_cast %6 : vector<8xf32> to vector<8x1xf32>
    %8 = arith.maximumf %5, %7 : vector<8x1xf32>
    %9 = vector.broadcast %8 : vector<8x1xf32> to vector<8x128xf32>
    %10 = arith.subf %4, %9 : vector<8x128xf32>
    %11 = math.exp %10 : vector<8x128xf32>
    %12 = arith.subf %5, %8 : vector<8x1xf32>
    %13 = math.exp %12 : vector<8x1xf32>
    %c0_5 = arith.constant 0 : index
    %c0_6 = arith.constant 0 : index
    %14 = vector.load %arg7[%c0_5, %c0_6] : memref<8x1xf32, #tpu.memory_space<vmem>>, vector<8x1xf32>
    %15 = arith.mulf %13, %14 : vector<8x1xf32>
    %cst_7 = arith.constant dense<0.000000e+00> : vector<8xf32>
    %16 = vector.multi_reduction <add>, %11, %cst_7 [1] : vector<8x128xf32> to vector<8xf32>
    %17 = vector.shape_cast %16 : vector<8xf32> to vector<8x1xf32>
    %18 = arith.addf %15, %17 : vector<8x1xf32>
    %c0_8 = arith.constant 0 : index
    %c0_9 = arith.constant 0 : index
    %19 = vector.load %arg7[%c0_8, %c0_9] : memref<8x1xf32, #tpu.memory_space<vmem>>, vector<8x1xf32>
    tpu.vector_store %arg7[%c0_8, %c0_9], %18 {strides = array<i32>} : memref<8x1xf32, #tpu.memory_space<vmem>>, vector<8x1xf32>,
    %c0_10 = arith.constant 0 : index
    %c0_11 = arith.constant 0 : index
    %20 = vector.load %arg6[%c0_10, %c0_11] : memref<8x1xf32, #tpu.memory_space<vmem>>, vector<8x1xf32>
    tpu.vector_store %arg6[%c0_10, %c0_11], %8 {strides = array<i32>} : memref<8x1xf32, #tpu.memory_space<vmem>>, vector<8x1xf32>,
    %c0_12 = arith.constant 0 : index
    %c0_13 = arith.constant 0 : index
    %c0_14 = arith.constant 0 : index
    %21 = vector.load %arg4[%c0_12, %c0_13, %c0_14] : memref<1x32x128xf32, #tpu.memory_space<vmem>>, vector<1x32x128xf32>
    %22 = vector.shape_cast %21 : vector<1x32x128xf32> to vector<32x128xf32>
    %cst_15 = arith.constant dense<0.000000e+00> : vector<8x32xf32>
    %23 = tpu.matmul %11, %22, %cst_15 {dimension_numbers = #tpu.dot_dimension_numbers<[1], [1], [0], [0], [0, 0, 1, 0], [], []>} : vector<8x128xf32>, vector<32x128xf32>, vector<8x32xf32> -> vector<8x32xf32>
    %c0_16 = arith.constant 0 : index
    %c0_17 = arith.constant 0 : index
    %24 = vector.load %arg8[%c0_16, %c0_17] : memref<8x32xf32, #tpu.memory_space<vmem>>, vector<8x32xf32>
    %25 = vector.broadcast %13 : vector<8x1xf32> to vector<8x32xf32>
    %26 = arith.mulf %24, %25 : vector<8x32xf32>
    %27 = arith.addf %26, %23 : vector<8x32xf32>
    %c0_18 = arith.constant 0 : index
    %c0_19 = arith.constant 0 : index
    %28 = vector.load %arg8[%c0_18, %c0_19] : memref<8x32xf32, #tpu.memory_space<vmem>>, vector<8x32xf32>
    tpu.vector_store %arg8[%c0_18, %c0_19], %27 {strides = array<i32>} : memref<8x32xf32, #tpu.memory_space<vmem>>, vector<8x32xf32>,
    %c1_i32 = arith.constant 1 : i32
    %29 = arith.cmpi eq, %arg2, %c1_i32 : i32
    %30 = arith.extui %29 : i1 to i32
    %c0_i32_20 = arith.constant 0 : i32
    %31 = arith.cmpi ne, %30, %c0_i32_20 : i32
    scf.if %31 {
      %c0_21 = arith.constant 0 : index
      %c0_22 = arith.constant 0 : index
      %32 = vector.load %arg7[%c0_21, %c0_22] : memref<8x1xf32, #tpu.memory_space<vmem>>, vector<8x1xf32>
      %33 = tpu.reciprocal %32 : vector<8x1xf32> -> vector<8x1xf32>
      %c0_23 = arith.constant 0 : index
      %c0_24 = arith.constant 0 : index
      %34 = vector.load %arg8[%c0_23, %c0_24] : memref<8x32xf32, #tpu.memory_space<vmem>>, vector<8x32xf32>
      %35 = vector.broadcast %33 : vector<8x1xf32> to vector<8x32xf32>
      %36 = arith.mulf %34, %35 : vector<8x32xf32>
      %c0_25 = arith.constant 0 : index
      %c0_26 = arith.constant 0 : index
      %c0_27 = arith.constant 0 : index
      %37 = vector.load %arg5[%c0_25, %c0_26, %c0_27] : memref<1x8x32xf32, #tpu.memory_space<vmem>>, vector<1x8x32xf32>
      %38 = vector.shape_cast %37 : vector<1x8x32xf32> to vector<8x32xf32>
      %39 = vector.shape_cast %36 : vector<8x32xf32> to vector<1x8x32xf32>
      tpu.vector_store %arg5[%c0_25, %c0_26, %c0_27], %39 {strides = array<i32>} : memref<1x8x32xf32, #tpu.memory_space<vmem>>, vector<1x8x32xf32>,
    } else {
    }
    return
  }
  func.func @transform_0(%arg0: i32, %arg1: i32, %arg2: i32) -> (i32, i32, i32) {
    %c0_i32 = arith.constant 0 : i32
    %c0_i32_0 = arith.constant 0 : i32
    return %arg0, %c0_i32, %arg2 : i32, i32, i32
  }
  func.func @transform_1(%arg0: i32, %arg1: i32, %arg2: i32) -> (i32, i32, i32) {
    %c0_i32 = arith.constant 0 : i32
    return %arg0, %arg1, %arg2 : i32, i32, i32
  }
  func.func @transform_2(%arg0: i32, %arg1: i32, %arg2: i32) -> (i32, i32, i32) {
    %c0_i32 = arith.constant 0 : i32
    %c0_i32_0 = arith.constant 0 : i32
    return %arg0, %c0_i32, %arg1 : i32, i32, i32
  }
}

</mosaic_0001>

<bundles_post_ra>
// kernel: tpu_custom_call.1
= control target key start
LH: loop header
LB: loop body
LE: loop exit
PB: predicated region body
PF: predicated region fallthrough
CT: control target
= control target key end

     0   :  { %s1089_s0 = inlined_call_operand.hbm [shape: f32[2,8,256], index: 0, kind: input, shape index: {}]   ;;  %s1090_s1 = inlined_call_operand.hbm [shape: f32[2,32,256], index: 1, kind: input, shape index: {}]   ;;  %s1091_s2 = inlined_call_operand.hbm [shape: f32[2,8,32], index: 2, kind: output, shape index: {}]  }
   0x1   :  { %1095 = sst [smem:[#allocation19_spill]] %s1089_s0 }
   0x2   :  { %7 = vsyncpa [#allocation6], 0 }
   0x3   :  { %9 = vsyncpa [#allocation6 + $0x1], 0 }
   0x4   :  { %10 = vsyncpa [#allocation9], 0 }
   0x5   :  { %12 = vsyncpa [#allocation9 + $0x1], 0 }
   0x6   :  { %13 = vsyncpa [#allocation7], 0 }
   0x7   :  { %15 = vsyncpa [#allocation7 + $0x1], 0  ;;  %s863_s9 = smov 0   ;;  %s865_s10 = smov 0  }
   0x8   :  { %s867_s11 = smov 0   ;;  %s869_s12 = smov 0  }
   0x9   :  { %s871_s13 = smov 0   ;;  %s873_s14 = smov 0  }
   0xa   :  { %s875_s15 = smov 0   ;;  %s877_s16 = smov 0  }
   0xb   :  { %s879_s17 = smov 0   ;;  %s881_s18 = smov 0  }
   0xc   :  { %s883_s19 = smov 0  }
   0xd LB: > { %1096 = sst [smem:[#allocation14_spill]] %s814_s14  ;;  %s493_s20 = sadd.s32 4294967295, %s834_s19   ;;  %s834_s19 = sphi %s883_s19, %s21_s19   ;;  %s830_s18 = sphi %s881_s18, %s1122_s18   ;;  %s826_s17 = sphi %s879_s17, %s1121_s17   ;;  %s822_s16 = sphi %s877_s16, %s1120_s16   ;;  %s818_s15 = sphi %s875_s15, %s1119_s15   ;;  %s814_s14 = sphi %s873_s14, %s1118_s14   ;;  %s810_s13 = sphi %s871_s13, %s1117_s13   ;;  %s806_s12 = sphi %s869_s12, %s1116_s12   ;;  %s802_s11 = sphi %s867_s11, %s1115_s11   ;;  %s798_s10 = sphi %s865_s10, %s1114_s10   ;;  %s794_s9 = sphi %s863_s9, %s1113_s9  }
   0xe   : > { %s494_s21 = sadd.s32 4294967294, %s834_s19   ;;  %s33_s22 = sadd.s32 1, %s826_s17 }
   0xf   : > { %s40_s23 = sadd.s32 1, %s830_s18  ;;  %p34_p0 = scmp.ge.s32.totalorder %s33_s22, 2 }
  0x10   : > { %s49_s24 = sadd.s32 1, %s814_s14  ;;  %p56_p1 = scmp.ne.s32.totalorder %s814_s14, %s810_s13 }
  0x11   : > { %p57_p2 = scmp.eq.s32.totalorder %s834_s19, 0  ;;  %s1124_s22 = smov (%p34_p0, %s33_s22), 0 }
  0x12   : > { %1097 = sst [smem:[#allocation15_spill]] %s1124_s22  ;;  %s1126_s23 = smov (!%p34_p0, %s40_s23), %s830_s18 }
  0x13   : > { %s45_s25 = ssub.s32 %s826_s17, %s1124_s22  ;;  %p929_p3 = por %p57_p2, %p56_p1 }
  0x14   : > { %p42_p4 = scmp.ge.s32.totalorder %s1126_s23, 2  ;;  %p62_p5 = scmp.ne.s32.totalorder %s810_s13, %s806_s12 }
  0x15   : > { %p63_p6 = scmp.eq.s32.totalorder %s493_s20, 0  ;;  %s107_s27 = sadd.s32 1, %s802_s11 }
  0x16   : > { %s1128_s23 = smov (%p42_p4, %s1126_s23), 0  ;;  %p117_p8 = scmp.ne.s32.totalorder %s802_s11, %s798_s10 }
  0x17   : > { %1099 = sst [smem:[#allocation16_spill]] %s1128_s23  ;;  %p937_p7 = por %p63_p6, %p62_p5 }
  0x18   : > { %s44_s29 = ssub.s32 %s830_s18, %s1128_s23  ;;  %p118_p9 = scmp.eq.s32.totalorder %s493_s20, 3 }
  0x19   : > { %s46_s30 = sor.u32 %s45_s25, %s44_s29  ;;  %p105_p10 = scmp.eq.s32.totalorder %s44_s29, 0 }
  0x1a   : > { %p47_p11 = scmp.eq.s32.totalorder %s46_s30, 0  ;;  %p945_p12 = por %p118_p9, %p117_p8 }
  0x1b   : > { %s950_s4 = scalar_select %p105_p10, %s802_s11, %s107_s27  }
  0x1c   : > { %s953_s5 = scalar_select %p47_p11, %s814_s14, %s49_s24  }
  0x1d   : > { %1102 = sst [smem:[#allocation17_spill]] %s950_s4  ;;  %p123_p13 = scmp.ne.s32.totalorder %s798_s10, %s794_s9 }
  0x1e   : > { %1103 = sst [smem:[#allocation18_spill]] %s953_s5  ;;  %p124_p0 = scmp.eq.s32.totalorder %s494_s21, 3 }
  0x1f   : > { %p546_p1 = scmp.lt.s32.totalorder %s834_s19, 4  ;;  %s963_s7 = sand.u32 1, %s814_s14  }
  0x20   : > { %p958_p2 = por %p124_p0, %p123_p13  ;;  %s497_s8 = sshll.u32 %s963_s7, 3 }
  0x21   : > { %s498_s12 = sshll.u32 %s830_s18, 1  ;;  %s148_s25 = scalar_lea.vmem [#allocation5], %s497_s8 }
  0x22   : > { %s153_s20 = sadd.s32 %s826_s17, %s498_s12  ;;  %s157_s27 = sshll.u32 %s148_s25, 4  ;;  %s158_s27 = int_to_ptr.vmem [resolvable:$true] %s157_s27 }
  0x23   : > { %s499_s29 = sshll.u32 %s153_s20, 7  ;;  %s1105_s0 = sld [smem:[#allocation19_spill]] }
  0x24   : > { %p973_p4 = pnand %p546_p1, %p929_p3  ;;  %s500_s22 = sshll.u32 %s963_s7, 5 }
  0x25   : > { %s145_s5 = scalar_lea.sflag [#allocation6], %s963_s7  ;;  %s667_s12 = scalar_lea.vmem %s158_s27, 128 }
  0x26   : > { %p656_p5 = pneg %p973_p4  ;;  %p668_p6 = scmp.ne.s32.totalorder %s158_s27, %s667_s12 }
  0x27   : > { %s836_s8 = smov [#allocation5]  }
  0x28   : > { %p670_p8 = pnand %p668_p6, %p656_p5  ;;  %s672_s20 = sshll.u32 %s836_s8, 4  ;;  %s673_s20 = int_to_ptr.vmem [resolvable:$false] %s672_s20 }
  0x29   : > { %s155_s21 = scalar_lea.hbm %s1105_s0, %s499_s29  ;;  %s674_s26 = scalar_lea.vmem %s673_s20, 256 }
  0x2a   : > { %p671_p9 = pneg %p670_p8  ;;  %p675_p3 = scmp.lt.s32.totalorder %s158_s27, %s673_s20 }
  0x2b   : > { %p676_p10 = scmp.lt.s32.totalorder %s674_s26, %s667_s12 }
  0x2d   : > { %p677_p11 = por %p676_p10, %p675_p3 }
  0x2f   : > { %p678_p13 = pnand %p677_p11, %p671_p9 }
  0x31   : > { %681 = shalt.err (!%p678_p13)
}
  0x32   : > { %538 = dma.hbm_to_vmem [thread:$0]  (!%p973_p4), %s155_s21, 128, %s158_s27, %s145_s5  }
  0x33   : > { %s501_s25 = sshll.u32 %s830_s18, 3  ;;  %p503_p0 = scmp.ge.s32.totalorder %s834_s19, 1 }
  0x34   : > { %s176_s29 = sadd.s32 %s826_s17, %s501_s25  ;;  %p187_p1 = scmp.lt.s32.totalorder %s834_s19, 5 }
  0x35   : > { %s502_s24 = sshll.u32 %s176_s29, 7  ;;  %s168_s30 = scalar_lea.vmem [#allocation8], %s500_s22 }
  0x36   : > { %s179_s8 = sshll.u32 %s168_s30, 4  ;;  %p990_p6 = pnand %p503_p0, %p187_p1  ;;  %s180_s8 = int_to_ptr.vmem [resolvable:$true] %s179_s8 }
  0x37   : > { %s178_s0 = scalar_lea.hbm %s1090_s1, %s502_s24  ;;  %s165_s14 = scalar_lea.sflag [#allocation9], %s963_s7 }
  0x38   : > { %s695_s4 = scalar_lea.vmem %s180_s8, 512  ;;  %s837_s5 = smov [#allocation8]  }
  0x39   : > { %p696_p8 = scmp.ne.s32.totalorder %s180_s8, %s695_s4  ;;  %s700_s27 = sshll.u32 %s837_s5, 4  ;;  %s701_s27 = int_to_ptr.vmem [resolvable:$false] %s700_s27 }
  0x3a   : > { %s702_s22 = scalar_lea.vmem %s701_s27, 1024  ;;  %p703_p10 = scmp.lt.s32.totalorder %s180_s8, %s701_s27 }
  0x3b   : > { %p698_p9 = pnand %p696_p8, %p656_p5  ;;  %p704_p11 = scmp.lt.s32.totalorder %s702_s22, %s695_s4 }
  0x3d   : > { %p699_p3 = pneg %p698_p9  ;;  %p705_p13 = por %p704_p11, %p703_p10 }
  0x3f   : > { %p706_p0 = pnand %p705_p13, %p699_p3 }
  0x41   : > { %709 = shalt.err (!%p706_p0)
}
  0x42   : > { %s838_s21 = smov 256   ;;  %s839_s25 = smov 128  }
  0x43   : > { %s840_s29 = smov 8   ;;  %191 = sbr.rel (%p990_p6) target bundleno = 730 (0x2da), region = 28 }
  0x44   : > { %541 = dma.hbm_to_vmem [thread:$0]  (!%p973_p4), %s178_s0, 512, %s180_s8, %s165_s14, %s838_s21, %s839_s25, %s840_s29  }
  0x45   : > { %s193_s7 = sand.u32 (!%p990_p6), 1, %s810_s13  }
  0x46   : > { %s504_s24 = sshll.u32 (!%p990_p6), %s193_s7, 3  ;;  %s194_s30 = scalar_lea.sflag (!%p990_p6), [#allocation6], %s193_s7 }
  0x47   : > { %s197_s20 = scalar_lea.vmem (!%p990_p6), [#allocation5], %s504_s24 }
  0x48   : > { %781 = dma.done.wait (%p937_p7), %s194_s30, 128  }
  0x49   : > { %783 = vsyncadd (%p937_p7), %s194_s30, 4294967168  ;;  %s505_s4 = sshll.u32 %s193_s7, 5  ;;  %s203_s26 = scalar_lea.sflag [#allocation9], %s193_s7 }
  0x4a   : > { %s1010_s5 = scalar_lea.vmem [#allocation8], %s505_s4 }
  0x4b   : > { %785 = dma.done.wait (%p937_p7), %s203_s26, 512  }
  0x4c   : > { %787 = vsyncadd (%p937_p7), %s203_s26, 4294966784  ;;  %s229_s0 = sand.u32 1, %s798_s10   ;;  %p507_p4 = scmp.ne.s32.totalorder %s818_s15, 0 }
  0x4d   : > { %s1019_s14 = sshll.u32 %s229_s0, 3 }
  0x4e   : > { %s231_s23 = scalar_lea.vmem [#allocation10], %s1019_s14  ;;  %236 = sbr.rel (%p507_p4) target bundleno = 86 (0x56), region = 40 }
  0x53   : > { %vm237_vm0 = vcmask 7168   ;;  %vm240_vm1 = vcmask 261120   ;;  %v841_v0 = vmov -inf   ;;  %v842_v1 = vmov 0.0  }
  0x54   : > { %238 = vst.msk [vmem:[#allocation2] sm:$0xff] %vm237_vm0, %v841_v0  ;;  %239 = vst.msk [vmem:[#allocation3] sm:$0xff] %vm237_vm0, %v842_v1 }
  0x55   : > { %241 = vst.msk [vmem:[#allocation4] sm:$0xff] %vm240_vm1, %v842_v1 }
  0x56 PF: > { %v242_v2 = vld [vmem:[%s197_s20] sm:$0xff]  ;;  %v843_v3 = vmov 0   ;;  %vm263_vm2 = vcmask 7168   ;;  %v844_v7 = vmov 0.0   ;;  %vm845_vm3 = vmmov 0   ;;  %v267_v11 = vld [vmem:[%s1010_s5 + $0x8] sm:$0xff] }
  0x57   : > { %244 = vmax.xlane.f32.xlu0 %v242_v2  ;;  %646 = vset.pattern.permute.xlu1 %v843_v3  ;;  %v269_v8 = vld [vmem:[%s1010_s5 + $0x18] sm:$0xff]  ;;  %v268_v10 = vld [vmem:[%s1010_s5 + $0x10] sm:$0xff]  ;;  %v266_v12 = vld [vmem:[%s1010_s5] sm:$0xff]  ;;  %vm348_vm4 = vcmask 261120   ;;  %p508_p7 = scmp.ne.s32.totalorder %s818_s15, 1 }
  0x58   : > { %645 = vset.pattern.permute.xlu0 %v843_v3  ;;  %518 = vmatprep.subr.mxu0 %v844_v7 }
  0x59   : > { %519 = vmatpush3.xpose.msra.mxu0 %v269_v8  ;;  %526 = vmatprep.mubr.msk.f32.mxu0 %vm845_vm3, %v844_v7 }
  0x5a   : > { %520 = vmatprep.subr.mxu0 %v844_v7 }
  0x5b   : > { %v243_v4 = vld [vmem:[#allocation2] sm:$0xff]  ;;  %v258_v19 = vld [vmem:[#allocation3] sm:$0xff] }
  0x5c   : > { %v340_v23 = vld [vmem:[#allocation4] sm:$0xff] }
  0x5d   : > { %521 = vmatpush3.xpose.msra.mxu0 %v268_v10 }
  0x5e   : > { %522 = vmatprep.subr.mxu0 %v844_v7 }
  0x61   : > { %523 = vmatpush3.xpose.msra.mxu0 %v267_v11 }
  0x62   : > { %524 = vmatprep.subr.mxu0 %v844_v7 }
  0x65   : > { %525 = vmatpush3.xpose.msra.mxu0 %v266_v12 }
  0xe0   : > { %v245_v5 = vpop.xlane.xlu0 %244 }
  0xe1   : > { %v246_v6 = vmax.f32 %v243_v4, %v245_v5 }
  0xe3   : > { %v255_v9 = vsub.f32 %v243_v4, %v246_v6  ;;  %265 = vst.msk [vmem:[#allocation2] sm:$0xff] %vm263_vm2, %v246_v6  ;;  %249 = vperm.xlu0 %645, %v246_v6  }
  0xe5   : > { %v256_v17 = vmul.f32 1.442695, %v255_v9 }
 0x15e   : > { %v250_v13 = vpop.permute.xlu0 %249 }
 0x15f   : > { %v252_v14 = vsub.f32 %v242_v2, %v250_v13 }
 0x161   : > { %v253_v15 = vmul.f32 1.442695, %v252_v14 }
 0x163   : > { %647 = vpow2.f32 %v253_v15 }
 0x164   : > { %649 = vpow2.f32 %v256_v17 }
 0x170   : > { %v648_v16 = vpop.eup %647 }
 0x171   : > { %260 = vadd.xlane.f32.xlu1 %v648_v16  ;;  %527 = vmatmul.mubr.f32.vlgmr.msra.gmra.mxu0 %v648_v16  ;;  %v650_v18 = vpop.eup %649 }
 0x172   : > { %v259_v20 = vmul.f32 %v650_v18, %v258_v19 }
 0x182   : > { %343 = vperm.xlu1 %646, %v650_v18  }
 0x1fa   : > { %v261_v21 = vpop.xlane.xlu1 %260 }
 0x1fb   : > { %v262_v22 = vadd.f32 %v261_v21, %v259_v20 }
 0x1fd   : > { %264 = vst.msk [vmem:[#allocation3] sm:$0xff] %vm263_vm2, %v262_v22 }
 0x1fe   : > { %v344_v24 = vpop.permute.xlu1 %343 }
 0x1ff   : > { %v346_v25 = vmul.f32 %v344_v24, %v340_v23 }
 0x230   : > { %353 = sbr.rel (%p508_p7) target bundleno = 707 (0x2c3), region = 44 }
 0x231   : > { %v336_v26 = vpop.f32.mrf.mxu0 }
 0x232   : > { %v347_v27 = vadd.f32 %v346_v25, %v336_v26 }
 0x233   : > { %v528_v28 = vpop.f32.mrf.mxu0 }
 0x234   : > { %349 = vst.msk [vmem:[#allocation4] sm:$0xff] %vm348_vm4, %v347_v27 }
 0x235   : > { %v354_v29 = vld [vmem:[#allocation3] sm:$0xff]  ;;  %v846_v30 = vmov 0  }
 0x236   : > { %651 = vset.pattern.permute.xlu0 %v846_v30  ;;  %652 = vrcp.f32 %v354_v29 }
 0x23b   : > { %v356_v32 = vld [vmem:[#allocation4] sm:$0xff] }
 0x243   : > { %v653_v31 = vpop.eup %652 }
 0x244   : > { %359 = vperm.xlu0 %651, %v653_v31  }
 0x2bf   : > { %v360_v33 = vpop.permute.xlu0 %359 }
 0x2c0   : > { %v362_v34 = vmul.f32 %v360_v33, %v356_v32 }
 0x2c2   : > { %363 = vst.msk [vmem:[%s231_s23] sm:$0xff] %vm348_vm4, %v362_v34 }
 0x2c3 PF: > { %s510_s28 = sshll.u32 %s822_s16, 7  ;;  %s379_s27 = sshll.u32 %s231_s23, 4  ;;  %s380_s27 = int_to_ptr.vmem [resolvable:$true] %s379_s27 }
 0x2c4   : > { %s377_s12 = scalar_lea.hbm %s1091_s2, %s510_s28  ;;  %s365_s22 = scalar_lea.sflag [#allocation7], %s229_s0 }
 0x2c5   : > { %s710_s21 = scalar_lea.vmem %s380_s27, 128  ;;  %s847_s25 = smov [#allocation10]  }
 0x2c6   : > { %p711_p5 = scmp.ne.s32.totalorder %s380_s27, %s710_s21  ;;  %s714_s29 = sshll.u32 %s847_s25, 4  ;;  %s715_s29 = int_to_ptr.vmem [resolvable:$false] %s714_s29 }
 0x2c7   : > { %s716_s7 = scalar_lea.vmem %s715_s29, 256  ;;  %p717_p8 = scmp.lt.s32.totalorder %s380_s27, %s715_s29 }
 0x2c8   : > { %p712_p1 = pnand %p711_p5, %p945_p12  ;;  %p718_p9 = scmp.lt.s32.totalorder %s716_s7, %s710_s21 }
 0x2ca   : > { %p713_p6 = pneg %p712_p1  ;;  %p719_p3 = por %p718_p9, %p717_p8 }
 0x2cc   : > { %p720_p10 = pnand %p719_p3, %p713_p6 }
 0x2ce   : > { %723 = shalt.err (!%p720_p10)
}
 0x2cf   : > { %s724_s16 = scalar_lea.hbm %s377_s12, 128  ;;  %s728_s20 = scalar_lea.hbm %s1091_s2, 256 }
 0x2d0   : > { %p725_p11 = scmp.ne.s32.totalorder %s377_s12, %s724_s16  ;;  %p729_p4 = scmp.lt.s32.totalorder %s377_s12, %s1091_s2 }
 0x2d1   : > { %p730_p7 = scmp.lt.s32.totalorder %s728_s20, %s724_s16 }
 0x2d2   : > { %p726_p13 = pnand %p725_p11, %p945_p12 }
 0x2d3   : > { %p731_p5 = por %p730_p7, %p729_p4 }
 0x2d4   : > { %p727_p0 = pneg %p726_p13 }
 0x2d6   : > { %p732_p1 = pnand %p731_p5, %p727_p0 }
 0x2d8   : > { %735 = shalt.err (!%p732_p1)
}
 0x2d9   : > { %533 = dma.vmem_to_hbm [thread:$0]  (%p945_p12), %s380_s27, 128, %s377_s12, %s365_s22  }
 0x2da PF: > { %p547_p6 = scmp.ge.s32.totalorder %s834_s19, 2  ;;  %s391_s5 = sand.u32 1, %s794_s9  }
 0x2db   : > { %s392_s0 = scalar_lea.sflag [#allocation7], %s391_s5 }
 0x2dc   : > { %p543_p8 = pnand %p547_p6, %p958_p2 }
 0x2de   : > { %p544_p9 = pneg %p543_p8 }
 0x2e0   : > { %789 = dma.done.wait (%p544_p9), %s392_s0, 128  }
 0x2e1   : > { %791 = vsyncadd (%p544_p9), %s392_s0, 4294967168  ;;  %s21_s19 = sadd.s32 1, %s834_s19   ;;  %s1108_s14 = sld [smem:[#allocation17_spill]] }
 0x2e2   : > { %p18_p3 = scmp.ge.s32.totalorder %s21_s19, 6   ;;  %s1109_s3 = sld [smem:[#allocation14_spill]] }
 0x2e3   : > { %s1110_s23 = sld [smem:[#allocation18_spill]]  ;;  %s1113_s9 = smov %s798_s10 }
 0x2e4   : > { %s1111_s28 = sld [smem:[#allocation15_spill]]  ;;  %s1114_s10 = smov %s802_s11 }
 0x2e5   : > { %s1112_s8 = sld [smem:[#allocation16_spill]]  ;;  %s1116_s12 = smov %s810_s13 }
 0x2e6   : > { %s1119_s15 = smov %s826_s17  ;;  %s1120_s16 = smov %s830_s18 }
 0x2e7   : > { %s1115_s11 = smov %s1108_s14  ;;  %20 = sbr.rel (!%p18_p3) target bundleno = 13 (0xd), region = 94 }
 0x2e8   : > { %s1117_s13 = smov %s1109_s3 }
 0x2e9   : > { %s1118_s14 = smov %s1110_s23 }
 0x2ea   : > { %s1121_s17 = smov %s1111_s28 }
 0x2eb   : > { %s1122_s18 = smov %s1112_s8 }
 0x2ec   :  { %397 = vsyncpa [#allocation6], 1 }
 0x2ed   :  { %399 = vsyncpa [#allocation6 + $0x1], 1 }
 0x2ee   :  { %400 = vsyncpa [#allocation9], 1 }
 0x2ef   :  { %402 = vsyncpa [#allocation9 + $0x1], 1 }
 0x2f0   :  { %403 = vsyncpa [#allocation7], 1 }
 0x2f1   :  { %405 = vsyncpa [#allocation7 + $0x1], 1 }

</bundles_post_ra>
